<compile_context>
chip_gen: v7x
topology: tpu7x:2x2x1
jax: 0.10.0
libtpu: 0.0.40
codegen_flags: <defaults>
</compile_context>

<pallas_src>
import jax
import jax.numpy as jnp
from jax.experimental import pallas as pl
from jax.experimental.pallas import tpu as pltpu


# ----------------------------------------------------------------------------
# Kernel
# ----------------------------------------------------------------------------
def _sage_kernel(col_ref, cnt_ref,                       # scalar prefetch (SMEM)
                 adj_ref, xnb_ref, xroot_ref, invdeg_ref,
                 w_ref, wr_ref, b_ref,
                 o_ref, acc_ref):
    # col_ref:    (nb_row * n_steps,) int32  column-block schedule (flattened)
    # cnt_ref:    (nb_row,)           int32  # of valid blocks per row tile
    # adj_ref:    (tile_n, tile_k)    int8   edge counts for block (i, col[i,k])
    # xnb_ref:    (tile_k, C_in)      bf16   neighbor features for that block
    # xroot_ref:  (tile_n, C_in)      bf16   root features for row tile i
    # invdeg_ref: (tile_n, 1)         f32    1 / max(degree, 1)
    # w_ref/wr_ref: (C_in, C_out_p)   bf16   weight / root_weight (lane-padded)
    # b_ref:      (1, C_out_p)        f32    bias (lane-padded)
    # o_ref:      (tile_n, C_out_p)
    # acc_ref:    (tile_n, C_in)      f32    neighbor-sum accumulator
    i = pl.program_id(0)
    k = pl.program_id(1)
    n_steps = pl.num_programs(1)

    @pl.when(k == 0)
    def _():
        acc_ref[...] = jnp.zeros_like(acc_ref)

    # Only accumulate for the valid (non-padded) blocks of this row tile.
    @pl.when(k < cnt_ref[i])
    def _():
        a = adj_ref[...].astype(jnp.bfloat16)        # int8 HBM stream -> bf16 MXU
        acc_ref[...] += jnp.dot(a, xnb_ref[...],
                                preferred_element_type=jnp.float32)

    @pl.when(k == n_steps - 1)
    def _():
        # Mean aggregation; agg is intentionally rounded to bf16 so both
        # epilogue matmuls stay on the fast bf16 MXU path (f32 accumulation).
        agg = (acc_ref[...] * invdeg_ref[...]).astype(jnp.bfloat16)
        out = jnp.dot(agg, w_ref[...], preferred_element_type=jnp.float32)
        out = out + jnp.dot(xroot_ref[...], wr_ref[...],
                            preferred_element_type=jnp.float32)
        o_ref[...] = (out + b_ref[...]).astype(o_ref.dtype)


# ----------------------------------------------------------------------------
# Tiling / VMEM budgeting
# ----------------------------------------------------------------------------
def _vmem_budget_bytes():
    # Generation-aware budget: ~48 MiB on v7x (64 MiB physical per TC),
    # ~96 MiB on v5e/v6e (128 MiB physical).  Capability probe only.
    try:
        info = pltpu.get_tpu_info()
        cap = int(getattr(info, "vmem_capacity_bytes", 64 * 1024 * 1024))
    except Exception:  # noqa: BLE001 - hardware probe, conservative fallback
        cap = 64 * 1024 * 1024
    return cap * 3 // 4


def _vmem_need_bytes(tn, tk, c_in, c_out_p):
    return (2 * tn * tk * 1                 # adjacency (int8), double buffered
            + 2 * tk * c_in * 2             # neighbor features (bf16)
            + 2 * tn * c_in * 2             # root features (bf16)
            + 2 * tn * 4                    # inv_deg (f32)
            + 2 * 2 * c_in * c_out_p * 2    # weight + root_weight (bf16)
            + 2 * c_out_p * 4               # bias (f32)
            + 2 * tn * c_out_p * 4          # output tile (f32)
            + tn * c_in * 4)                # accumulator scratch (f32)


def _pick_tiles(n, c_in, c_out_p, budget):
    tk_cands = [t for t in (512, 256, 128) if n % t == 0] or [n]
    tn_cands = [t for t in (1024, 512, 256, 128, 64, 32, 16, 8) if n % t == 0]
    assert tn_cands, "N must be a multiple of 8 (pad the graph)"

    best, best_score = None, None
    for tn in tn_cands:
        for tk in tk_cands:
            if _vmem_need_bytes(tn, tk, c_in, c_out_p) > budget:
                continue
            nb_row, nb_col = n // tn, n // tk
            score = (
                tn >= 128,      # fill the MXU M dimension (v5e: 4x 128x128 MXUs)
                nb_row >= 2,    # give the parallel axis real work
                nb_row >= 4,    # >=2 row tiles per v7x TensorCore for pipelining
                nb_col >= 2,    # real contraction axis; x never fully resident
                tn, tk,
            )
            if best_score is None or score > best_score:
                best, best_score = (tn, tk), score
    assert best is not None, "no tile configuration fits the VMEM budget"
    return best


def _block_schedule(adj_counts, n, tile_n, tile_k):
    """Per row-tile list of non-empty column blocks, padded by repeating the last."""
    nb_row, nb_col = n // tile_n, n // tile_k
    blk = adj_counts.reshape(nb_row, tile_n, nb_col, tile_k)
    nnz = jnp.any(blk != 0, axis=(1, 3))                           # (nb_row, nb_col)
    counts = jnp.sum(nnz, axis=1).astype(jnp.int32)                # (nb_row,)

    col_ids = jnp.arange(nb_col, dtype=jnp.int32)[None, :]
    sort_key = jnp.where(nnz, col_ids, col_ids + nb_col)           # empties last
    perm = jnp.argsort(sort_key, axis=1).astype(jnp.int32)         # (nb_row, nb_col)

    try:
        n_steps = max(int(jnp.max(counts)), 1)
    except jax.errors.ConcretizationTypeError:
        n_steps = nb_col                                           # worst case under jit

    col_sorted = perm[:, :n_steps]
    last_valid = jnp.take_along_axis(
        col_sorted, jnp.maximum(counts - 1, 0)[:, None], axis=1)
    step = jnp.arange(n_steps, dtype=jnp.int32)[None, :]
    # Padded steps repeat the last valid block index -> pipeline elides the DMA.
    col_id = jnp.where(step < counts[:, None], col_sorted, last_valid)
    return col_id.reshape(-1), counts, n_steps


# ----------------------------------------------------------------------------
# Wrapper
# ----------------------------------------------------------------------------
def l_sage_forward(adj_counts, x, weight, root_weight, bias, *,
                   tile_n=None, tile_k=None):
    """adj_counts: [N, N] edge multiplicities; x: [N, C_in]; returns [N, C_out]."""
    n, c_in = x.shape
    c_out = weight.shape[1]
    c_out_p = ((c_out + 127) // 128) * 128          # lane-dense weights/output

    budget = _vmem_budget_bytes()
    if tile_n is None or tile_k is None:
        ptn, ptk = _pick_tiles(n, c_in, c_out_p, budget)
        tile_n = tile_n or ptn
        tile_k = tile_k or ptk
    assert n % tile_n == 0 and n % tile_k == 0, \
        "N must be a multiple of the tile sizes (pad the graph)"

    # Exact mean scaling from the original counts (unaffected by the int8 cast).
    deg = jnp.sum(adj_counts.astype(jnp.float32), axis=-1, keepdims=True)
    inv_deg = (1.0 / jnp.maximum(deg, 1.0)).astype(jnp.float32)    # (N, 1)

    # int8 adjacency stream in HBM; exact for edge multiplicities <= 127.
    try:
        assert float(jnp.max(adj_counts)) <= 127.0, \
            "edge multiplicities must fit int8 for the adjacency stream"
    except jax.errors.ConcretizationTypeError:
        pass  # under jit the caller guarantees multiplicities <= 127
    adj_i8 = adj_counts.astype(jnp.int8)

    x_bf16 = x.astype(jnp.bfloat16)
    w_p = jnp.zeros((c_in, c_out_p), jnp.bfloat16).at[:, :c_out].set(
        weight.astype(jnp.bfloat16))
    wr_p = jnp.zeros((c_in, c_out_p), jnp.bfloat16).at[:, :c_out].set(
        root_weight.astype(jnp.bfloat16))
    b_p = jnp.zeros((1, c_out_p), jnp.float32).at[:, :c_out].set(
        bias.reshape(1, c_out).astype(jnp.float32))

    col_id, counts, n_steps = _block_schedule(adj_counts, n, tile_n, tile_k)
    nb_row = n // tile_n
    grid = (nb_row, n_steps)

    in_specs = [
        pl.BlockSpec((tile_n, tile_k),
                     lambda i, k, col, cnt: (i, col[i * n_steps + k])),   # adj (int8)
        pl.BlockSpec((tile_k, c_in),
                     lambda i, k, col, cnt: (col[i * n_steps + k], 0)),   # neighbor x
        pl.BlockSpec((tile_n, c_in), lambda i, k, col, cnt: (i, 0)),      # root x
        pl.BlockSpec((tile_n, 1), lambda i, k, col, cnt: (i, 0)),         # inv_deg
        pl.BlockSpec((c_in, c_out_p), lambda i, k, col, cnt: (0, 0)),     # weight
        pl.BlockSpec((c_in, c_out_p), lambda i, k, col, cnt: (0, 0)),     # root_weight
        pl.BlockSpec((1, c_out_p), lambda i, k, col, cnt: (0, 0)),        # bias
    ]
    out_specs = pl.BlockSpec((tile_n, c_out_p), lambda i, k, col, cnt: (i, 0))

    # Only raise the scoped VMEM limit when actually needed, and never above
    # the generation budget (v7x physical VMEM is 64 MiB per TensorCore).
    vmem_need = _vmem_need_bytes(tile_n, tile_k, c_in, c_out_p)
    vmem_limit = None
    if vmem_need > 12 * 1024 * 1024:
        vmem_limit = min(vmem_need * 3 // 2 + (1 << 20), budget)

    cost = pl.CostEstimate(
        flops=2 * nb_row * n_steps * tile_n * tile_k * c_in
              + 4 * n * c_in * c_out_p,
        transcendentals=0,
        bytes_accessed=(nb_row * n_steps * tile_n * tile_k            # int8 adj blocks
                        + nb_row * n_steps * tile_k * c_in * 2        # neighbor x blocks
                        + n * c_in * 2 + n * 4
                        + 2 * c_in * c_out_p * 2 + c_out_p * 4
                        + n * c_out_p * 4),
    )

    out_padded = pl.pallas_call(
        _sage_kernel,
        out_shape=jax.ShapeDtypeStruct((n, c_out_p), x.dtype),
        grid_spec=pltpu.PrefetchScalarGridSpec(
            num_scalar_prefetch=2,
            grid=grid,
            in_specs=in_specs,
            out_specs=out_specs,
            scratch_shapes=[pltpu.VMEM((tile_n, c_in), jnp.float32)],
        ),
        compiler_params=pltpu.CompilerParams(
            dimension_semantics=("parallel", "arbitrary"),
            vmem_limit_bytes=vmem_limit,
        ),
        cost_estimate=cost,
    )(col_id, counts, adj_i8, x_bf16, x_bf16, inv_deg, w_p, wr_p, b_p)

    return out_padded[:, :c_out]


# ----------------------------------------------------------------------------
# Reference + demo
# ----------------------------------------------------------------------------
def _glorot(key, shape):
    fan_in, fan_out = shape
    limit = (6.0 / (fan_in + fan_out)) ** 0.5
    return jax.random.uniform(key, shape, jnp.float32, -limit, limit)


def _reference(adj_counts, x, weight, root_weight, bias):
    deg = jnp.sum(adj_counts, axis=-1, keepdims=True)
    agg = (adj_counts @ x) / jnp.maximum(deg, 1.0)
    return agg @ weight + x @ root_weight + bias


if __name__ == "__main__":
    key = jax.random.PRNGKey(0)
    k_x, k_w, k_wr, k_src, k_dst = jax.random.split(key, 5)

    N = 256        # number of nodes
    C_in = 32      # in_channels
    C_out = 64     # out_channels
    E = 2048       # number of (directed) edges

    # Node features.
    x = jax.random.normal(k_x, (N, C_in), jnp.float32)

    # Parameters (glorot / zeros, matching reset_parameters()).
    weight = _glorot(k_w, (C_in, C_out))
    root_weight = _glorot(k_wr, (C_in, C_out))
    bias = jnp.zeros((C_out,), jnp.float32)

    # Synthetic edge_index -> dense adjacency with edge multiplicities,
    # standing in for SparseTensor(row=edge_index[0], col=edge_index[1]).
    rows = jax.random.randint(k_src, (E,), 0, N)
    cols = jax.random.randint(k_dst, (E,), 0, N)
    adj_counts = jnp.zeros((N, N), jnp.float32).at[rows, cols].add(1.0)

    out = l_sage_forward(adj_counts, x, weight, root_weight, bias)
    out = jax.block_until_ready(out)

    ref = _reference(adj_counts, x, weight, root_weight, bias)
    assert out.shape == (N, C_out)
    # bf16 feature stream / bf16 agg rounding (f32 accumulation) vs. pure-f32 ref.
    assert jnp.allclose(out, ref, atol=5e-2, rtol=5e-2), (
        "mismatch vs reference: max abs err "
        f"{jnp.max(jnp.abs(out - ref))}")

    print("KERNEL_OK")
</pallas_src>

<mosaic_0001>
module attributes {stable_mosaic.version = 11 : i64} {
  func.func @_sage_kernel(%arg0: i32, %arg1: i32, %arg2: memref<4xi32, #tpu.memory_space<smem>>, %arg3: memref<2xi32, #tpu.memory_space<smem>>, %arg4: memref<128x128xi8, #tpu.memory_space<vmem>>, %arg5: memref<128x32xbf16, #tpu.memory_space<vmem>>, %arg6: memref<128x32xbf16, #tpu.memory_space<vmem>>, %arg7: memref<128x1xf32, #tpu.memory_space<vmem>>, %arg8: memref<32x128xbf16, #tpu.memory_space<vmem>>, %arg9: memref<32x128xbf16, #tpu.memory_space<vmem>>, %arg10: memref<1x128xf32, #tpu.memory_space<vmem>>, %arg11: memref<128x128xf32, #tpu.memory_space<vmem>>, %arg12: memref<128x32xf32, #tpu.memory_space<vmem>>) attributes {dimension_semantics = [#tpu.dimension_semantics<parallel>, #tpu.dimension_semantics<arbitrary>], iteration_bounds = array<i64: 2, 2>, scalar_prefetch = 2 : i64, scratch_operands = 1 : i64, tpu.core_type = #tpu.core_type<tc>, window_params = [{transform_indices = @transform_0, window_bounds = array<i64: 128, 128>}, {transform_indices = @transform_1, window_bounds = array<i64: 128, 32>}, {transform_indices = @transform_2, window_bounds = array<i64: 128, 32>}, {transform_indices = @transform_3, window_bounds = array<i64: 128, 1>}, {pipeline_mode = #tpu.pipeline_mode<synchronous>, transform_indices = @transform_4, window_bounds = array<i64: 32, 128>}, {pipeline_mode = #tpu.pipeline_mode<synchronous>, transform_indices = @transform_5, window_bounds = array<i64: 32, 128>}, {pipeline_mode = #tpu.pipeline_mode<synchronous>, transform_indices = @transform_6, window_bounds = array<i64: 1, 128>}, {transform_indices = @transform_7, window_bounds = array<i64: 128, 128>}]} {
    %c0_i32 = arith.constant 0 : i32
    %0 = arith.cmpi eq, %arg1, %c0_i32 : i32
    %1 = arith.extui %0 : i1 to i32
    %c0_i32_0 = arith.constant 0 : i32
    %2 = arith.cmpi ne, %1, %c0_i32_0 : i32
    scf.if %2 {
      %cst = arith.constant 0.000000e+00 : f32
      %11 = vector.broadcast %cst : f32 to vector<128x32xf32>
      %c0 = arith.constant 0 : index
      %c0_3 = arith.constant 0 : index
      %12 = vector.load %arg12[%c0, %c0_3] : memref<128x32xf32, #tpu.memory_space<vmem>>, vector<128x32xf32>
      tpu.vector_store %arg12[%c0, %c0_3], %11 {strides = array<i32>} : memref<128x32xf32, #tpu.memory_space<vmem>>, vector<128x32xf32>,
    } else {
    }
    %3 = arith.index_cast %arg0 : i32 to index
    %4 = memref.load %arg3[%3] : memref<2xi32, #tpu.memory_space<smem>>
    %5 = arith.cmpi slt, %arg1, %4 : i32
    %6 = arith.extui %5 : i1 to i32
    %c0_i32_1 = arith.constant 0 : i32
    %7 = arith.cmpi ne, %6, %c0_i32_1 : i32
    scf.if %7 {
      %c0 = arith.constant 0 : index
      %c0_3 = arith.constant 0 : index
      %11 = vector.load %arg4[%c0, %c0_3] : memref<128x128xi8, #tpu.memory_space<vmem>>, vector<128x128xi8>
      %12 = arith.sitofp %11 : vector<128x128xi8> to vector<128x128xbf16>
      %c0_4 = arith.constant 0 : index
      %c0_5 = arith.constant 0 : index
      %13 = vector.load %arg12[%c0_4, %c0_5] : memref<128x32xf32, #tpu.memory_space<vmem>>, vector<128x32xf32>
      %c0_6 = arith.constant 0 : index
      %c0_7 = arith.constant 0 : index
      %14 = vector.load %arg5[%c0_6, %c0_7] : memref<128x32xbf16, #tpu.memory_space<vmem>>, vector<128x32xbf16>
      %cst = arith.constant dense<0.000000e+00> : vector<128x32xf32>
      %15 = tpu.matmul %12, %14, %cst {dimension_numbers = #tpu.dot_dimension_numbers<[1], [0], [0], [1], [0, 0, 1, 1], [], []>} : vector<128x128xbf16>, vector<128x32xbf16>, vector<128x32xf32> -> vector<128x32xf32>
      %16 = arith.addf %13, %15 : vector<128x32xf32>
      %c0_8 = arith.constant 0 : index
      %c0_9 = arith.constant 0 : index
      %17 = vector.load %arg12[%c0_8, %c0_9] : memref<128x32xf32, #tpu.memory_space<vmem>>, vector<128x32xf32>
      tpu.vector_store %arg12[%c0_8, %c0_9], %16 {strides = array<i32>} : memref<128x32xf32, #tpu.memory_space<vmem>>, vector<128x32xf32>,
    } else {
    }
    %c1_i32 = arith.constant 1 : i32
    %8 = arith.cmpi eq, %arg1, %c1_i32 : i32
    %9 = arith.extui %8 : i1 to i32
    %c0_i32_2 = arith.constant 0 : i32
    %10 = arith.cmpi ne, %9, %c0_i32_2 : i32
    scf.if %10 {
      %c0 = arith.constant 0 : index
      %c0_3 = arith.constant 0 : index
      %11 = vector.load %arg12[%c0, %c0_3] : memref<128x32xf32, #tpu.memory_space<vmem>>, vector<128x32xf32>
      %c0_4 = arith.constant 0 : index
      %c0_5 = arith.constant 0 : index
      %12 = vector.load %arg7[%c0_4, %c0_5] : memref<128x1xf32, #tpu.memory_space<vmem>>, vector<128x1xf32>
      %13 = vector.broadcast %12 : vector<128x1xf32> to vector<128x32xf32>
      %14 = arith.mulf %11, %13 : vector<128x32xf32>
      %15 = arith.truncf %14 : vector<128x32xf32> to vector<128x32xbf16>
      %c0_6 = arith.constant 0 : index
      %c0_7 = arith.constant 0 : index
      %16 = vector.load %arg8[%c0_6, %c0_7] : memref<32x128xbf16, #tpu.memory_space<vmem>>, vector<32x128xbf16>
      %cst = arith.constant dense<0.000000e+00> : vector<128x128xf32>
      %17 = tpu.matmul %15, %16, %cst {dimension_numbers = #tpu.dot_dimension_numbers<[1], [0], [0], [1], [0, 0, 1, 1], [], []>} : vector<128x32xbf16>, vector<32x128xbf16>, vector<128x128xf32> -> vector<128x128xf32>
      %c0_8 = arith.constant 0 : index
      %c0_9 = arith.constant 0 : index
      %18 = vector.load %arg6[%c0_8, %c0_9] : memref<128x32xbf16, #tpu.memory_space<vmem>>, vector<128x32xbf16>
      %c0_10 = arith.constant 0 : index
      %c0_11 = arith.constant 0 : index
      %19 = vector.load %arg9[%c0_10, %c0_11] : memref<32x128xbf16, #tpu.memory_space<vmem>>, vector<32x128xbf16>
      %cst_12 = arith.constant dense<0.000000e+00> : vector<128x128xf32>
      %20 = tpu.matmul %18, %19, %cst_12 {dimension_numbers = #tpu.dot_dimension_numbers<[1], [0], [0], [1], [0, 0, 1, 1], [], []>} : vector<128x32xbf16>, vector<32x128xbf16>, vector<128x128xf32> -> vector<128x128xf32>
      %21 = arith.addf %17, %20 : vector<128x128xf32>
      %c0_13 = arith.constant 0 : index
      %c0_14 = arith.constant 0 : index
      %22 = vector.load %arg10[%c0_13, %c0_14] : memref<1x128xf32, #tpu.memory_space<vmem>>, vector<1x128xf32>
      %23 = vector.broadcast %22 : vector<1x128xf32> to vector<128x128xf32>
      %24 = arith.addf %21, %23 : vector<128x128xf32>
      %c0_15 = arith.constant 0 : index
      %c0_16 = arith.constant 0 : index
      %25 = vector.load %arg11[%c0_15, %c0_16] : memref<128x128xf32, #tpu.memory_space<vmem>>, vector<128x128xf32>
      tpu.vector_store %arg11[%c0_15, %c0_16], %24 {strides = array<i32>} : memref<128x128xf32, #tpu.memory_space<vmem>>, vector<128x128xf32>,
    } else {
    }
    return
  }
  func.func @transform_0(%arg0: i32, %arg1: i32, %arg2: memref<4xi32, #tpu.memory_space<smem>>, %arg3: memref<2xi32, #tpu.memory_space<smem>>) -> (i32, i32) {
    %c2_i32 = arith.constant 2 : i32
    %0 = arith.muli %arg0, %c2_i32 : i32
    %1 = arith.addi %0, %arg1 : i32
    %2 = arith.index_cast %1 : i32 to index
    %3 = memref.load %arg2[%2] : memref<4xi32, #tpu.memory_space<smem>>
    %c0_i32 = arith.constant 0 : i32
    return %arg0, %3 : i32, i32
  }
  func.func @transform_1(%arg0: i32, %arg1: i32, %arg2: memref<4xi32, #tpu.memory_space<smem>>, %arg3: memref<2xi32, #tpu.memory_space<smem>>) -> (i32, i32) {
    %c2_i32 = arith.constant 2 : i32
    %0 = arith.muli %arg0, %c2_i32 : i32
    %1 = arith.addi %0, %arg1 : i32
    %2 = arith.index_cast %1 : i32 to index
    %3 = memref.load %arg2[%2] : memref<4xi32, #tpu.memory_space<smem>>
    %c0_i32 = arith.constant 0 : i32
    %c0_i32_0 = arith.constant 0 : i32
    return %3, %c0_i32 : i32, i32
  }
  func.func @transform_2(%arg0: i32, %arg1: i32, %arg2: memref<4xi32, #tpu.memory_space<smem>>, %arg3: memref<2xi32, #tpu.memory_space<smem>>) -> (i32, i32) {
    %c0_i32 = arith.constant 0 : i32
    %c0_i32_0 = arith.constant 0 : i32
    return %arg0, %c0_i32 : i32, i32
  }
  func.func @transform_3(%arg0: i32, %arg1: i32, %arg2: memref<4xi32, #tpu.memory_space<smem>>, %arg3: memref<2xi32, #tpu.memory_space<smem>>) -> (i32, i32) {
    %c0_i32 = arith.constant 0 : i32
    %c0_i32_0 = arith.constant 0 : i32
    return %arg0, %c0_i32 : i32, i32
  }
  func.func @transform_4(%arg0: i32, %arg1: i32, %arg2: memref<4xi32, #tpu.memory_space<smem>>, %arg3: memref<2xi32, #tpu.memory_space<smem>>) -> (i32, i32) {
    %c0_i32 = arith.constant 0 : i32
    %c0_i32_0 = arith.constant 0 : i32
    %c0_i32_1 = arith.constant 0 : i32
    return %c0_i32, %c0_i32_0 : i32, i32
  }
  func.func @transform_5(%arg0: i32, %arg1: i32, %arg2: memref<4xi32, #tpu.memory_space<smem>>, %arg3: memref<2xi32, #tpu.memory_space<smem>>) -> (i32, i32) {
    %c0_i32 = arith.constant 0 : i32
    %c0_i32_0 = arith.constant 0 : i32
    %c0_i32_1 = arith.constant 0 : i32
    return %c0_i32, %c0_i32_0 : i32, i32
  }
  func.func @transform_6(%arg0: i32, %arg1: i32, %arg2: memref<4xi32, #tpu.memory_space<smem>>, %arg3: memref<2xi32, #tpu.memory_space<smem>>) -> (i32, i32) {
    %c0_i32 = arith.constant 0 : i32
    %c0_i32_0 = arith.constant 0 : i32
    %c0_i32_1 = arith.constant 0 : i32
    return %c0_i32, %c0_i32_0 : i32, i32
  }
  func.func @transform_7(%arg0: i32, %arg1: i32, %arg2: memref<4xi32, #tpu.memory_space<smem>>, %arg3: memref<2xi32, #tpu.memory_space<smem>>) -> (i32, i32) {
    %c0_i32 = arith.constant 0 : i32
    %c0_i32_0 = arith.constant 0 : i32
    return %arg0, %c0_i32 : i32, i32
  }
}

</mosaic_0001>

<bundles_post_ra>
// kernel: tpu_custom_call.1
= control target key start
LH: loop header
LB: loop body
LE: loop exit
PB: predicated region body
PF: predicated region fallthrough
CT: control target
= control target key end

     0   :  { %s2185_s0 = inlined_call_operand.vmem [shape: s32[4], index: 0, kind: input, shape index: {}]   ;;  %s2186_s2 = inlined_call_operand.vmem [shape: s8[256,256], index: 2, kind: input, shape index: {}]   ;;  %s2187_s3 = inlined_call_operand.vmem [shape: bf16[256,32], index: 3, kind: input, shape index: {}]   ;;  %s2188_s4 = inlined_call_operand.vmem [shape: bf16[256,32], index: 4, kind: input, shape index: {}]   ;;  %s2189_s5 = inlined_call_operand.vmem [shape: f32[256,1], index: 5, kind: input, shape index: {}]   ;;  %s2190_s6 = inlined_call_operand.vmem [shape: bf16[32,128], index: 6, kind: input, shape index: {}]   ;;  %s2191_s7 = inlined_call_operand.vmem [shape: bf16[32,128], index: 7, kind: input, shape index: {}]   ;;  %s2192_s8 = inlined_call_operand.vmem [shape: f32[1,128], index: 8, kind: input, shape index: {}]   ;;  %s2193_s9 = inlined_call_operand.hbm [shape: f32[256,128], index: 9, kind: output, shape index: {}]   ;;  %s2194_s1 = inlined_call_operand.vmem [shape: s32[2], index: 1, kind: input, shape index: {}]  }
   0x1   :  { %2202 = sst [smem:[#allocation17_spill]] %s2186_s2  ;;  %s14_s11 = sshll.u32 %s2185_s0, 4  ;;  %s15_s11 = int_to_ptr.vmem [resolvable:$true] %s14_s11 }
   0x2   :  { %2203 = sst [smem:[#allocation18_spill]] %s2190_s6  ;;  %s18_s14 = sshll.u32 %s2194_s1, 4  ;;  %s19_s14 = int_to_ptr.vmem [resolvable:$true] %s18_s14 }
   0x3   :  { %2204 = sst [smem:[#allocation19_spill]] %s2192_s8  ;;  %s1668_s15 = scalar_lea.vmem %s15_s11, 16 }
   0x4   :  { %2205 = sst [smem:[#allocation20_spill]] %s2193_s9  ;;  %p1669_p0 = scmp.ne.s32.totalorder %s15_s11, %s1668_s15 }
   0x5   :  { %p1673_p1 = scmp.lt.s32.totalorder %s15_s11, %s15_s11  ;;  %p1674_p2 = scmp.lt.s32.totalorder %s1668_s15, %s1668_s15 }
   0x7   :  { %p1675_p3 = por %p1674_p2, %p1673_p1 }
   0x9   :  { %p1676_p4 = pnand %p1675_p3, %p1669_p0 }
   0xb   :  { %1679 = shalt.err (!%p1676_p4)  }
   0xc   :  { %s1806_s16 = smov [#allocation4]   ;;  %s1680_s17 = scalar_lea.vmem %s19_s14, 16 }
   0xd   :  { %17 = dma.vmem_to_smem %s15_s11, 16, %s1806_s16, [#allocation3] }
   0xe   :  { %p1681_p5 = scmp.ne.s32.totalorder %s19_s14, %s1680_s17  ;;  %p1685_p6 = scmp.lt.s32.totalorder %s19_s14, %s19_s14 }
   0xf   :  { %p1686_p7 = scmp.lt.s32.totalorder %s1680_s17, %s1680_s17 }
  0x11   :  { %p1687_p8 = por %p1686_p7, %p1685_p6 }
  0x13   :  { %p1688_p9 = pnand %p1687_p8, %p1681_p5 }
  0x15   :  { %1691 = shalt.err (!%p1688_p9)  }
  0x16   :  { %s1807_s0 = smov [#allocation5]  }
  0x17   :  { %21 = dma.vmem_to_smem %s19_s14, 16, %s1807_s0, [#allocation3] }
  0x18   :  { %1760 = dma.done.wait [#allocation3], 32 }
  0x19   :  { %1761 = vsyncadd [#allocation3], 4294967264 }
  0x1a   :  { %23 = sfence }
  0x1b   :  { %24 = vsyncpa [#allocation8], 0 }
  0x1c   :  { %26 = vsyncpa [#allocation8 + $0x1], 0  ;;  %s1869_s1 = smov 0   ;;  %s1871_s18 = smov 0  }
  0x1d   :  { %s1873_s19 = smov 0   ;;  %s1875_s20 = smov 0  }
  0x1e   :  { %s1877_s21 = smov 0   ;;  %s1879_s22 = smov 0  }
  0x1f   :  { %s1881_s23 = smov 0   ;;  %s1883_s24 = smov 0  }
  0x20   :  { %s1885_s25 = smov 0   ;;  %s1887_s26 = smov 0  }
  0x21 LB: > { %2206 = sst [smem:[#allocation11_spill]] %s1796_s24  ;;  %s1343_s27 = sadd.s32 4294967295, %s1804_s26   ;;  %s1804_s26 = sphi %s1887_s26, %s32_s26   ;;  %s1800_s25 = sphi %s1885_s25, %s2225_s25   ;;  %s1796_s24 = sphi %s1883_s24, %s2224_s24   ;;  %s1792_s23 = sphi %s1881_s23, %s2223_s23   ;;  %s1788_s22 = sphi %s1879_s22, %s2231_s22   ;;  %s1784_s21 = sphi %s1877_s21, %s2230_s21   ;;  %s1780_s20 = sphi %s1875_s20, %s2229_s20   ;;  %s1776_s19 = sphi %s1873_s19, %s2228_s19   ;;  %s1772_s18 = sphi %s1871_s18, %s2227_s18   ;;  %s1768_s1 = sphi %s1869_s1, %s2226_s1  }
  0x22   : > { %2207 = sst [smem:[#allocation12_spill]] %s1800_s25  ;;  %s41_s28 = sadd.s32 1, %s1796_s24 }
  0x23   : > { %s44_s29 = sadd.s32 1, %s1800_s25  ;;  %p42_p10 = scmp.ge.s32.totalorder %s41_s28, 2 }
  0x24   : > { %s1345_s30 = sshll.u32 %s1800_s25, 1  ;;  %s1344_s10 = sadd.s32 4294967294, %s1804_s26  }
  0x25   : > { %s49_s11 = sadd.s32 %s1796_s24, %s1345_s30  ;;  %s2233_s28 = smov (%p42_p10, %s41_s28), 0 }
  0x26   : > { %2208 = sst [smem:[#allocation13_spill]] %s2233_s28  ;;  %s2235_s29 = smov (!%p42_p10, %s44_s29), %s1800_s25 }
  0x27   : > { %s50_s12 = sld [smem:[#allocation4 + %s49_s11]]  ;;  %p66_p11 = scmp.ne.s32.totalorder %s1784_s21, %s1780_s20 }
  0x28   : > { %p46_p12 = scmp.ge.s32.totalorder %s2235_s29, 2  ;;  %p67_p13 = scmp.eq.s32.totalorder %s1804_s26, 0 }
  0x29   : > { %s232_s13 = sadd.s32 1, %s1776_s19  ;;  %p242_p0 = scmp.ne.s32.totalorder %s1776_s19, %s1772_s18 }
  0x2a   : > { %s2237_s29 = smov (%p46_p12, %s2235_s29), 0  ;;  %p1936_p1 = por %p67_p13, %p66_p11 }
  0x2b   : > { %2209 = sst [smem:[#allocation14_spill]] %s2237_s29  ;;  %p243_p2 = scmp.eq.s32.totalorder %s1343_s27, 3 }
  0x2c   : > { %s1346_s15 = sshll.u32 %s2237_s29, 1  ;;  %s54_s16 = ssub.s32 %s1800_s25, %s2237_s29 }
  0x2d   : > { %s52_s17 = sadd.s32 %s1346_s15, %s2233_s28  ;;  %p230_p3 = scmp.eq.s32.totalorder %s54_s16, 0 }
  0x2e   : > { %s53_s0 = sld [smem:[#allocation4 + %s52_s17]]  ;;  %p1944_p4 = por %p243_p2, %p242_p0 }
  0x2f   : > { %s1949_s24 = scalar_select %p230_p3, %s1776_s19, %s232_s13  }
  0x30   : > { %p248_p5 = scmp.ne.s32.totalorder %s1772_s18, %s1768_s1  ;;  %p249_p6 = scmp.eq.s32.totalorder %s1344_s10, 3 }
  0x31   : > { %2212 = sst [smem:[#allocation15_spill]] %s1949_s24  ;;  %s59_s27 = sadd.s32 1, %s1784_s21 }
  0x32   : > { %p1953_p7 = por %p249_p6, %p248_p5  ;;  %p1350_p9 = scmp.ge.s32.totalorder %s1804_s26, 4 }
  0x34   : > { %s55_s8 = ssub.s32 %s50_s12, %s53_s0  ;;  %274 = sbr.rel (%p1350_p9) target bundleno = 71 (0x47), region = 28 }
  0x35   : > { %s56_s6 = sor.u32 %s55_s8, %s54_s16 }
  0x36   : > { %p57_p8 = scmp.eq.s32.totalorder %s56_s6, 0 }
  0x38   : > { %s1959_s29 = scalar_select %p57_p8, %s1784_s21, %s59_s27  }
  0x3a   : > { %2214 = sst [smem:[#allocation16_spill]] %s1959_s29 }
  0x3b   : > { %277 = sbr.rel (!%p1936_p1) target bundleno = 71 (0x47), region = 32  ;;  %s284_s13 = sld [smem:[#allocation4 + %s49_s11]] (%p1936_p1) }
  0x3c   : > { %s279_s10 = sand.u32 (%p1936_p1), 1, %s1784_s21   ;;  %s1411_s15 = sshll.u32 (%p1936_p1), %s1800_s25, 3 }
  0x3d   : > { %s1351_s17 = sshll.u32 (%p1936_p1), %s279_s10, 5  ;;  %s2215_s2 = sld [smem:[#allocation17_spill]] (%p1936_p1) }
  0x3e   : > { %s281_s16 = scalar_lea.vmem (%p1936_p1), [#allocation6], %s1351_s17 }
  0x41   : > { %s287_s28 = sadd.s32 (%p1936_p1), %s1411_s15, %s284_s13 }
  0x42   : > { %s1355_s24 = sshll.u32 %s287_s28, 3 }
  0x43   : > { %s289_s6 = scalar_lea.vmem %s2215_s2, %s1355_s24 }
  0x44   : > { %v323_v0 = vld [vmem:[%s289_s6] sm:$0xff]  ;;  %v325_v1 = vld [vmem:[%s289_s6 + $0x10] sm:$0xff] }
  0x45   : > { %v327_v2 = vld [vmem:[%s289_s6 + $0x20] sm:$0xff]  ;;  %324 = vst [vmem:[%s281_s16] sm:$0xff] %v323_v0  ;;  %326 = vst [vmem:[%s281_s16 + $0x8] sm:$0xff] %v325_v1  ;;  %v329_v3 = vld [vmem:[%s289_s6 + $0x30] sm:$0xff] }
  0x46   : > { %328 = vst [vmem:[%s281_s16 + $0x10] sm:$0xff] %v327_v2  ;;  %330 = vst [vmem:[%s281_s16 + $0x18] sm:$0xff] %v329_v3 }
  0x47 PF: > { %p1356_p10 = scmp.ge.s32.totalorder %s1804_s26, 1  ;;  %p368_p11 = scmp.lt.s32.totalorder %s1804_s26, 5 }
  0x49   : > { %p369_p12 = pnand %p1356_p10, %p368_p11 }
  0x4a   : > { %s375_s24 = sand.u32 (!%p369_p12), 1, %s1780_s20   ;;  %s2200_s28 = sand.u32 (!%p369_p12), 1, %s1772_s18  }
  0x4b   : > { %372 = sbr.rel (%p369_p12) target bundleno = 770 (0x302), region = 82  ;;  %s1357_s11 = sshll.u32 (!%p369_p12), %s375_s24, 5 }
  0x4c   : > { %s1358_s14 = sshll.u32 (!%p369_p12), %s2200_s28, 7  ;;  %s1359_s0 = sshll.u32 (!%p369_p12), %s1792_s23, 1 }
  0x4d   : > { %s1362_s27 = sshll.u32 (!%p369_p12), %s1792_s23, 4  ;;  %s429_s13 = sadd.s32 (!%p369_p12), %s1788_s22, %s1359_s0 }
  0x4e   : > { %p441_p13 = scmp.lt.s32.totalorder (!%p369_p12), %s1362_s27, 31  ;;  %s430_s10 = sld [smem:[#allocation4 + %s429_s13]] (!%p369_p12) }
  0x4f   : > { %s1995_s29 = scalar_lea.vmem (!%p369_p12), [#allocation7], %s1358_s14  ;;  %p1366_p1 = scmp.ne.s32.totalorder (!%p369_p12), %s1788_s22, 0 }
  0x52   : > { %s2239_s27 = smov (!%p441_p13, %s1362_s27), 31  ;;  %vm458_vm0 = vcmask (!%p1366_p1), 261120   ;;  %v1808_v4 = vmov (!%p1366_p1), 0.0  }
  0x53   : > { %s1363_s15 = sshll.u32 %s2239_s27, 2  ;;  %s1365_s17 = sshll.u32 %s2239_s27, 3  ;;  %459 = vst.msk [vmem:[#allocation2] sm:$0xff] (!%p1366_p1), %vm458_vm0, %v1808_v4  ;;  %460 = vst.msk [vmem:[#allocation2 + $0x8] sm:$0xff] (!%p1366_p1), %vm458_vm0, %v1808_v4 }
  0x54   : > { %s1981_s6 = scalar_lea.vmem %s2188_s4, %s1363_s15  ;;  %s1986_s20 = scalar_lea.vmem %s2189_s5, %s1365_s17  ;;  %461 = vst.msk [vmem:[#allocation2 + $0x10] sm:$0xff] (!%p1366_p1), %vm458_vm0, %v1808_v4  ;;  %462 = vst.msk [vmem:[#allocation2 + $0x18] sm:$0xff] (!%p1366_p1), %vm458_vm0, %v1808_v4 }
  0x55   : > { %s1360_s24 = sshll.u32 %s430_s10, 4  ;;  %s1993_s27 = scalar_lea.vmem [#allocation6], %s1357_s11  ;;  %463 = vst.msk [vmem:[#allocation2 + $0x20] sm:$0xff] (!%p1366_p1), %vm458_vm0, %v1808_v4  ;;  %464 = vst.msk [vmem:[#allocation2 + $0x28] sm:$0xff] (!%p1366_p1), %vm458_vm0, %v1808_v4 }
  0x56   : > { %p432_p0 = scmp.lt.s32.totalorder %s1360_s24, 31  ;;  %457 = sbr.rel (%p1366_p1) target bundleno = 93 (0x5d), region = 90  ;;  %465 = vst.msk [vmem:[#allocation2 + $0x30] sm:$0xff] (!%p1366_p1), %vm458_vm0, %v1808_v4  ;;  %466 = vst.msk [vmem:[#allocation2 + $0x38] sm:$0xff] (!%p1366_p1), %vm458_vm0, %v1808_v4 }
  0x57   : > { %467 = vst.msk [vmem:[#allocation2 + $0x40] sm:$0xff] (!%p1366_p1), %vm458_vm0, %v1808_v4  ;;  %468 = vst.msk [vmem:[#allocation2 + $0x48] sm:$0xff] (!%p1366_p1), %vm458_vm0, %v1808_v4 }
  0x58   : > { %s2241_s24 = smov (!%p432_p0, %s1360_s24), 31  ;;  %469 = vst.msk [vmem:[#allocation2 + $0x50] sm:$0xff] (!%p1366_p1), %vm458_vm0, %v1808_v4  ;;  %470 = vst.msk [vmem:[#allocation2 + $0x58] sm:$0xff] (!%p1366_p1), %vm458_vm0, %v1808_v4 }
  0x59   : > { %s1361_s28 = sshll.u32 %s2241_s24, 2  ;;  %471 = vst.msk [vmem:[#allocation2 + $0x60] sm:$0xff] (!%p1366_p1), %vm458_vm0, %v1808_v4  ;;  %472 = vst.msk [vmem:[#allocation2 + $0x68] sm:$0xff] (!%p1366_p1), %vm458_vm0, %v1808_v4 }
  0x5a   : > { %s1991_s13 = scalar_lea.vmem %s2187_s3, %s1361_s28  ;;  %473 = vst.msk [vmem:[#allocation2 + $0x70] sm:$0xff] (!%p1366_p1), %vm458_vm0, %v1808_v4  ;;  %474 = vst.msk [vmem:[#allocation2 + $0x78] sm:$0xff] (!%p1366_p1), %vm458_vm0, %v1808_v4 }
  0x5d PF: > { %s475_s2 = sld [smem:[#allocation5 + %s1792_s23]] }
  0x63   : > { %p1367_p2 = scmp.ge.s32.totalorder %s1788_s22, %s475_s2 }
  0x64   : > { %v1646_v5 = vld [vmem:[%s1991_s13] sm:$0xff] (!%p1367_p2)   ;;  %v1647_v6 = vld [vmem:[%s1991_s13 + $0x8] sm:$0xff] (!%p1367_p2)   ;;  %v1648_v7 = vld [vmem:[%s1991_s13 + $0x10] sm:$0xff] (!%p1367_p2)   ;;  %vm685_vm1 = vcmask (!%p1367_p2), 261120  }
  0x65   : > { %479 = sbr.rel (%p1367_p2) target bundleno = 359 (0x167), region = 94  ;;  %1449 = vmatprep.subr.bf16.mxu0 (!%p1367_p2), %v1646_v5  ;;  %1521 = vmatprep.subr.bf16.mxu1 (!%p1367_p2), %v1646_v5  ;;  %v1649_v8 = vld [vmem:[%s1991_s13 + $0x18] sm:$0xff] (!%p1367_p2)   ;;  %v480_v9 = vld [vmem:[%s1993_s27] sm:$0xff] (!%p1367_p2)  ;;  %v482_v10 = vld [vmem:[%s1993_s27 + $0x10] sm:$0xff] (!%p1367_p2) }
  0x66   : > { %1450 = vmatpush3.bf16.msra.mxu0 (!%p1367_p2), %v1646_v5  ;;  %1529 = vmatpush3.bf16.msra.mxu1 (!%p1367_p2), %v1646_v5  ;;  %v484_v11 = vunpack.c.l.s8.bf16 (!%p1367_p2), %v480_v9  ;;  %v488_v12 = vunpack.c.l.s8.bf16 (!%p1367_p2), %v482_v10  ;;  %v1650_v13 = vld [vmem:[%s1991_s13 + $0x20] sm:$0xff] (!%p1367_p2)   ;;  %v1651_v14 = vld [vmem:[%s1991_s13 + $0x28] sm:$0xff] (!%p1367_p2)   ;;  %v1652_v15 = vld [vmem:[%s1991_s13 + $0x30] sm:$0xff] (!%p1367_p2)   ;;  %v485_v19 = vunpack.c.h.s8.bf16 (!%p1367_p2), %v480_v9  ;;  %v489_v20 = vunpack.c.h.s8.bf16 (!%p1367_p2), %v482_v10 }
  0x67   : > { %1451 = vmatprep.subr.bf16.mxu0 (!%p1367_p2), %v1647_v6  ;;  %1522 = vmatprep.subr.bf16.mxu1 (!%p1367_p2), %v1647_v6  ;;  %v1653_v16 = vld [vmem:[%s1991_s13 + $0x38] sm:$0xff] (!%p1367_p2)   ;;  %v481_v17 = vld [vmem:[%s1993_s27 + $0x8] sm:$0xff] (!%p1367_p2)  ;;  %v494_v25 = vld [vmem:[#allocation2 + $0x10] sm:$0xff] (!%p1367_p2) }
  0x68   : > { %1465 = vmatprep.mubr.bf16.mxu0 (!%p1367_p2), %v484_v11  ;;  %1473 = vmatprep.mubr.bf16.mxu1 (!%p1367_p2), %v488_v12  ;;  %v483_v18 = vld [vmem:[%s1993_s27 + $0x18] sm:$0xff] (!%p1367_p2)  ;;  %v486_v21 = vunpack.c.l.s8.bf16 (!%p1367_p2), %v481_v17  ;;  %v487_v23 = vunpack.c.h.s8.bf16 (!%p1367_p2), %v481_v17  ;;  %v502_v26 = vld [vmem:[#allocation2 + $0x50] sm:$0xff] (!%p1367_p2)  ;;  %v492_v27 = vld [vmem:[#allocation2] sm:$0xff] (!%p1367_p2) }
  0x69   : > { %v490_v22 = vunpack.c.l.s8.bf16 (!%p1367_p2), %v483_v18  ;;  %v491_v24 = vunpack.c.h.s8.bf16 (!%p1367_p2), %v483_v18  ;;  %v500_v28 = vld [vmem:[#allocation2 + $0x40] sm:$0xff] (!%p1367_p2)  ;;  %v495_v31 = vld [vmem:[#allocation2 + $0x18] sm:$0xff] (!%p1367_p2)  ;;  %v493_v37 = vld [vmem:[#allocation2 + $0x8] sm:$0xff] (!%p1367_p2) }
  0x6a   : > { %1452 = vmatpush3.bf16.msra.mxu0 (!%p1367_p2), %v1647_v6  ;;  %1530 = vmatpush3.bf16.msra.mxu1 (!%p1367_p2), %v1647_v6  ;;  %v503_v32 = vld [vmem:[#allocation2 + $0x58] sm:$0xff] (!%p1367_p2)  ;;  %v501_v38 = vld [vmem:[#allocation2 + $0x48] sm:$0xff] (!%p1367_p2)  ;;  %v498_v49 = vld [vmem:[#allocation2 + $0x30] sm:$0xff] (!%p1367_p2) }
  0x6b   : > { %1453 = vmatprep.subr.bf16.mxu0 (!%p1367_p2), %v1648_v7  ;;  %1523 = vmatprep.subr.bf16.mxu1 (!%p1367_p2), %v1648_v7  ;;  %v506_v50 = vld [vmem:[#allocation2 + $0x70] sm:$0xff] (!%p1367_p2)  ;;  %v496_v51 = vld [vmem:[#allocation2 + $0x20] sm:$0xff] (!%p1367_p2)  ;;  %v499_v55 = vld [vmem:[#allocation2 + $0x38] sm:$0xff] (!%p1367_p2) }
  0x6c   : > { %v504_v52 = vld [vmem:[#allocation2 + $0x60] sm:$0xff]  ;;  %v507_v56 = vld [vmem:[#allocation2 + $0x78] sm:$0xff]  ;;  %v497_v61 = vld [vmem:[#allocation2 + $0x28] sm:$0xff] }
  0x6d   : > { %v505_v62 = vld [vmem:[#allocation2 + $0x68] sm:$0xff] }
  0x6e   : > { %1454 = vmatpush3.bf16.msra.mxu0 %v1648_v7  ;;  %1531 = vmatpush3.bf16.msra.mxu1 %v1648_v7 }
  0x6f   : > { %1455 = vmatprep.subr.bf16.mxu0 %v1649_v8  ;;  %1524 = vmatprep.subr.bf16.mxu1 %v1649_v8 }
  0x72   : > { %1456 = vmatpush3.bf16.msra.mxu0 %v1649_v8  ;;  %1532 = vmatpush3.bf16.msra.mxu1 %v1649_v8 }
  0x73   : > { %1457 = vmatprep.subr.bf16.mxu0 %v1650_v13  ;;  %1525 = vmatprep.subr.bf16.mxu1 %v1650_v13 }
  0x76   : > { %1458 = vmatpush3.bf16.msra.mxu0 %v1650_v13  ;;  %1533 = vmatpush3.bf16.msra.mxu1 %v1650_v13 }
  0x77   : > { %1459 = vmatprep.subr.bf16.mxu0 %v1651_v14  ;;  %1526 = vmatprep.subr.bf16.mxu1 %v1651_v14 }
  0x7a   : > { %1460 = vmatpush3.bf16.msra.mxu0 %v1651_v14  ;;  %1534 = vmatpush3.bf16.msra.mxu1 %v1651_v14 }
  0x7b   : > { %1461 = vmatprep.subr.bf16.mxu0 %v1652_v15  ;;  %1527 = vmatprep.subr.bf16.mxu1 %v1652_v15 }
  0x7e   : > { %1462 = vmatpush3.bf16.msra.mxu0 %v1652_v15  ;;  %1535 = vmatpush3.bf16.msra.mxu1 %v1652_v15 }
  0x7f   : > { %1463 = vmatprep.subr.bf16.mxu0 %v1653_v16  ;;  %1528 = vmatprep.subr.bf16.mxu1 %v1653_v16 }
  0x82   : > { %1464 = vmatpush3.bf16.msra.mxu0 %v1653_v16  ;;  %1536 = vmatpush3.bf16.msra.mxu1 %v1653_v16 }
  0x85   : > { %1466 = vmatmul.mubr.bf16.vlgmr.msra.gmra.mrb[0].mxu0 %v485_v19  ;;  %1474 = vmatmul.mubr.bf16.vlgmr.msra.gmra.mrb[0].mxu1 %v489_v20 }
  0x86   : > { %1469 = vmatprep.mubr.bf16.mxu0 %v486_v21  ;;  %1477 = vmatprep.mubr.bf16.mxu1 %v490_v22 }
  0x8d   : > { %1470 = vmatmul.mubr.bf16.gmra.mrb[4].mxu0 %v487_v23  ;;  %1478 = vmatmul.mubr.bf16.gmra.mrb[4].mxu1 %v491_v24 }
 0x158   : > { %v1467_v29 = vpop.f32.mrb[0].mxu0  ;;  %v1475_v30 = vpop.f32.mrb[0].mxu1 }
 0x159   : > { %v671_v33 = vadd.f32 %v1467_v29, %v494_v25  ;;  %v679_v34 = vadd.f32 %v1475_v30, %v502_v26  ;;  %v606_v35 = vpop.f32.mrb[1].mxu0  ;;  %v638_v36 = vpop.f32.mrb[1].mxu1 }
 0x15a   : > { %v669_v39 = vadd.f32 %v606_v35, %v492_v27  ;;  %v677_v40 = vadd.f32 %v638_v36, %v500_v28  ;;  %v1468_v41 = vpop.f32.mrb[2].mxu0  ;;  %v1476_v42 = vpop.f32.mrb[2].mxu1 }
 0x15b   : > { %688 = vst.msk [vmem:[#allocation2 + $0x10] sm:$0xff] %vm685_vm1, %v671_v33  ;;  %696 = vst.msk [vmem:[#allocation2 + $0x50] sm:$0xff] %vm685_vm1, %v679_v34  ;;  %v672_v43 = vadd.f32 %v1468_v41, %v495_v31  ;;  %v680_v44 = vadd.f32 %v1476_v42, %v503_v32  ;;  %v609_v45 = vpop.f32.mrb[3].mxu0  ;;  %v641_v46 = vpop.f32.mrb[3].mxu1 }
 0x15c   : > { %686 = vst.msk [vmem:[#allocation2] sm:$0xff] %vm685_vm1, %v669_v39  ;;  %694 = vst.msk [vmem:[#allocation2 + $0x40] sm:$0xff] %vm685_vm1, %v677_v40  ;;  %v670_v47 = vadd.f32 %v609_v45, %v493_v37  ;;  %v678_v48 = vadd.f32 %v641_v46, %v501_v38 }
 0x15d   : > { %689 = vst.msk [vmem:[#allocation2 + $0x18] sm:$0xff] %vm685_vm1, %v672_v43  ;;  %697 = vst.msk [vmem:[#allocation2 + $0x58] sm:$0xff] %vm685_vm1, %v680_v44 }
 0x15e   : > { %687 = vst.msk [vmem:[#allocation2 + $0x8] sm:$0xff] %vm685_vm1, %v670_v47  ;;  %695 = vst.msk [vmem:[#allocation2 + $0x48] sm:$0xff] %vm685_vm1, %v678_v48 }
 0x160   : > { %v1471_v53 = vpop.f32.mrb[4].mxu0  ;;  %v1479_v54 = vpop.f32.mrb[4].mxu1 }
 0x161   : > { %v675_v57 = vadd.f32 %v1471_v53, %v498_v49  ;;  %v683_v58 = vadd.f32 %v1479_v54, %v506_v50  ;;  %v622_v59 = vpop.f32.mrb[5].mxu0  ;;  %v654_v60 = vpop.f32.mrb[5].mxu1 }
 0x162   : > { %v673_v63 = vadd.f32 %v622_v59, %v496_v51  ;;  %v681_v0 = vadd.f32 %v654_v60, %v504_v52  ;;  %v1472_v1 = vpop.f32.mrb[6].mxu0  ;;  %v1480_v2 = vpop.f32.mrb[6].mxu1 }
 0x163   : > { %692 = vst.msk [vmem:[#allocation2 + $0x30] sm:$0xff] %vm685_vm1, %v675_v57  ;;  %700 = vst.msk [vmem:[#allocation2 + $0x70] sm:$0xff] %vm685_vm1, %v683_v58  ;;  %v676_v3 = vadd.f32 %v1472_v1, %v499_v55  ;;  %v684_v4 = vadd.f32 %v1480_v2, %v507_v56  ;;  %v625_v5 = vpop.f32.mrb[7].mxu0  ;;  %v657_v6 = vpop.f32.mrb[7].mxu1 }
 0x164   : > { %690 = vst.msk [vmem:[#allocation2 + $0x20] sm:$0xff] %vm685_vm1, %v673_v63  ;;  %698 = vst.msk [vmem:[#allocation2 + $0x60] sm:$0xff] %vm685_vm1, %v681_v0  ;;  %v674_v7 = vadd.f32 %v625_v5, %v497_v61  ;;  %v682_v8 = vadd.f32 %v657_v6, %v505_v62 }
 0x165   : > { %693 = vst.msk [vmem:[#allocation2 + $0x38] sm:$0xff] %vm685_vm1, %v676_v3  ;;  %701 = vst.msk [vmem:[#allocation2 + $0x78] sm:$0xff] %vm685_vm1, %v684_v4 }
 0x166   : > { %691 = vst.msk [vmem:[#allocation2 + $0x28] sm:$0xff] %vm685_vm1, %v674_v7  ;;  %699 = vst.msk [vmem:[#allocation2 + $0x68] sm:$0xff] %vm685_vm1, %v682_v8 }
 0x167 PF: > { %p1376_p3 = scmp.ne.s32.totalorder %s1788_s22, 1 }
 0x168   : > { %v724_v9 = vld [vmem:[%s1986_s20 + $0x10] sm:$0xff] (!%p1376_p3)  ;;  %v722_v10 = vld [vmem:[%s1986_s20] sm:$0xff] (!%p1376_p3)  ;;  %v1809_v11 = vmov (!%p1376_p3), 0   ;;  %v725_v12 = vld [vmem:[%s1986_s20 + $0x18] sm:$0xff] (!%p1376_p3)  ;;  %s2216_s14 = sld [smem:[#allocation18_spill]] (!%p1376_p3)  ;;  %vm918_vm2 = vcmask (!%p1376_p3), 261120  }
 0x169   : > { %705 = sbr.rel (%p1376_p3) target bundleno = 743 (0x2e7), region = 98  ;;  %1655 = vset.pattern.permute.xlu1 (!%p1376_p3), %v1809_v11  ;;  %1654 = vset.pattern.permute.xlu0 (!%p1376_p3), %v1809_v11  ;;  %v723_v13 = vld [vmem:[%s1986_s20 + $0x8] sm:$0xff] (!%p1376_p3)  ;;  %v726_v15 = vld [vmem:[%s1986_s20 + $0x20] sm:$0xff] (!%p1376_p3)  ;;  %v729_v19 = vld [vmem:[%s1986_s20 + $0x38] sm:$0xff] (!%p1376_p3)  ;;  %s2217_s16 = sld [smem:[#allocation19_spill]] (!%p1376_p3) }
 0x16a   : > { %750 = vperm.xlu1 (!%p1376_p3), %1655, %v724_v9   ;;  %740 = vperm.xlu0 (!%p1376_p3), %1654, %v722_v10   ;;  %v727_v14 = vld [vmem:[%s1986_s20 + $0x28] sm:$0xff] (!%p1376_p3)  ;;  %v1656_v16 = vld [vmem:[%s2191_s7] sm:$0xff] (!%p1376_p3)   ;;  %v728_v20 = vld [vmem:[%s1986_s20 + $0x30] sm:$0xff] (!%p1376_p3) }
 0x16b   : > { %1481 = vmatprep.subr.bf16.mxu1 (!%p1376_p3), %v1656_v16  ;;  %v1658_v18 = vld [vmem:[%s2191_s7 + $0x8] sm:$0xff] (!%p1376_p3)   ;;  %v1659_v21 = vld [vmem:[%s1981_s6] sm:$0xff] (!%p1376_p3)   ;;  %v1662_v25 = vld [vmem:[%s1981_s6 + $0x10] sm:$0xff] (!%p1376_p3)  }
 0x16c   : > { %1482 = vmatpush3.bf16.msra.mxu1 (!%p1376_p3), %v1656_v16  ;;  %1485 = vmatprep.mubr.msk.bf16.mxu1 (!%p1376_p3), %vm918_vm2, %v1659_v21  ;;  %v1661_v23 = vld [vmem:[%s1981_s6 + $0x8] sm:$0xff] (!%p1376_p3)   ;;  %v730_v26 = vld [vmem:[%s1986_s20 + $0x40] sm:$0xff] (!%p1376_p3)  ;;  %v733_v27 = vld [vmem:[%s1986_s20 + $0x58] sm:$0xff] (!%p1376_p3) }
 0x16d   : > { %1483 = vmatprep.subr.bf16.mxu1 (!%p1376_p3), %v1658_v18  ;;  %v731_v24 = vld [vmem:[%s1986_s20 + $0x48] sm:$0xff] (!%p1376_p3)  ;;  %v732_v28 = vld [vmem:[%s1986_s20 + $0x50] sm:$0xff] (!%p1376_p3)  ;;  %v1663_v29 = vld [vmem:[%s1981_s6 + $0x18] sm:$0xff] (!%p1376_p3)  }
 0x16e   : > { %755 = vperm.xlu1 (!%p1376_p3), %1655, %v725_v12   ;;  %745 = vperm.xlu0 (!%p1376_p3), %1654, %v723_v13   ;;  %v1657_v17 = vld [vmem:[%s2216_s14] sm:$0xff] (!%p1376_p3)   ;;  %v1660_v22 = vld [vmem:[%s2216_s14 + $0x8] sm:$0xff] (!%p1376_p3)   ;;  %v737_v33 = vld [vmem:[%s1986_s20 + $0x78] sm:$0xff] (!%p1376_p3) }
 0x16f   : > { %1501 = vmatprep.subr.bf16.mxu0 (!%p1376_p3), %v1657_v17  ;;  %v1664_v30 = vld [vmem:[%s1981_s6 + $0x20] sm:$0xff] (!%p1376_p3)   ;;  %v735_v31 = vld [vmem:[%s1986_s20 + $0x68] sm:$0xff] (!%p1376_p3)  ;;  %v736_v34 = vld [vmem:[%s1986_s20 + $0x70] sm:$0xff] (!%p1376_p3) }
 0x170   : > { %1502 = vmatpush3.bf16.msra.mxu0 %v1657_v17  ;;  %1484 = vmatpush3.bf16.msra.mxu1 %v1658_v18  ;;  %v734_v32 = vld [vmem:[%s1986_s20 + $0x60] sm:$0xff]  ;;  %v1665_v35 = vld [vmem:[%s1981_s6 + $0x28] sm:$0xff]   ;;  %v1666_v36 = vld [vmem:[%s1981_s6 + $0x30] sm:$0xff]  }
 0x171   : > { %1503 = vmatprep.subr.bf16.mxu0 %v1660_v22  ;;  %v1667_v37 = vld [vmem:[%s1981_s6 + $0x38] sm:$0xff]   ;;  %v708_v40 = vld [vmem:[#allocation2 + $0x10] sm:$0xff]  ;;  %v706_v41 = vld [vmem:[#allocation2] sm:$0xff] }
 0x172   : > { %765 = vperm.xlu1 %1655, %v727_v14   ;;  %760 = vperm.xlu0 %1654, %v726_v15   ;;  %v709_v42 = vld [vmem:[#allocation2 + $0x18] sm:$0xff]  ;;  %v707_v43 = vld [vmem:[#allocation2 + $0x8] sm:$0xff]  ;;  %v710_v51 = vld [vmem:[#allocation2 + $0x20] sm:$0xff] }
 0x173   : > { %1486 = vmatmul.mubr.msk.bf16.vlgmr.msra.gmra.mrb[0].mxu1 %vm918_vm2, %v1661_v23  ;;  %v711_v50 = vld [vmem:[#allocation2 + $0x28] sm:$0xff]  ;;  %v713_v58 = vld [vmem:[#allocation2 + $0x38] sm:$0xff]  ;;  %v712_v59 = vld [vmem:[#allocation2 + $0x30] sm:$0xff] }
 0x174   : > { %1504 = vmatpush3.bf16.msra.mxu0 %v1660_v22  ;;  %1489 = vmatprep.mubr.msk.bf16.mxu1 %vm918_vm2, %v1662_v25  ;;  %v715_v1 = vld [vmem:[#allocation2 + $0x48] sm:$0xff]  ;;  %v714_v2 = vld [vmem:[#allocation2 + $0x40] sm:$0xff]  ;;  %v717_v8 = vld [vmem:[#allocation2 + $0x58] sm:$0xff] }
 0x175   : > { %v716_v9 = vld [vmem:[#allocation2 + $0x50] sm:$0xff]  ;;  %v719_v15 = vld [vmem:[#allocation2 + $0x68] sm:$0xff]  ;;  %v718_v16 = vld [vmem:[#allocation2 + $0x60] sm:$0xff] }
 0x176   : > { %775 = vperm.xlu1 %1655, %v729_v19   ;;  %770 = vperm.xlu0 %1654, %v728_v20   ;;  %v721_v22 = vld [vmem:[#allocation2 + $0x78] sm:$0xff]  ;;  %v720_v23 = vld [vmem:[#allocation2 + $0x70] sm:$0xff] }
 0x17a   : > { %785 = vperm.xlu1 %1655, %v731_v24   ;;  %780 = vperm.xlu0 %1654, %v730_v26  }
 0x17b   : > { %1490 = vmatmul.mubr.msk.bf16.gmra.mrb[4].mxu1 %vm918_vm2, %v1663_v29 }
 0x17c   : > { %1493 = vmatprep.mubr.msk.bf16.mxu1 %vm918_vm2, %v1664_v30 }
 0x17e   : > { %795 = vperm.xlu1 %1655, %v733_v27   ;;  %790 = vperm.xlu0 %1654, %v732_v28  }
 0x182   : > { %805 = vperm.xlu1 %1655, %v735_v31   ;;  %800 = vperm.xlu0 %1654, %v734_v32  }
 0x183   : > { %1494 = vmatmul.mubr.msk.bf16.gmra.mrb[8].mxu1 %vm918_vm2, %v1665_v35 }
 0x184   : > { %1497 = vmatprep.mubr.msk.bf16.mxu1 %vm918_vm2, %v1666_v36 }
 0x186   : > { %815 = vperm.xlu1 %1655, %v737_v33   ;;  %810 = vperm.xlu0 %1654, %v736_v34  }
 0x18b   : > { %1498 = vmatmul.mubr.msk.bf16.gmra.mrb[12].mxu1 %vm918_vm2, %v1667_v37 }
 0x1e9   : > { %v751_v38 = vpop.permute.xlu1 %750  ;;  %v741_v39 = vpop.permute.xlu0 %740 }
 0x1ea   : > { %v820_v46 = vmul.f32 %v751_v38, %v708_v40  ;;  %v818_v47 = vmul.f32 %v741_v39, %v706_v41 }
 0x1ed   : > { %v756_v44 = vpop.permute.xlu1 %755  ;;  %v746_v45 = vpop.permute.xlu0 %745 }
 0x1ee   : > { %v821_v48 = vmul.f32 %v756_v44, %v709_v42  ;;  %v819_v49 = vmul.f32 %v746_v45, %v707_v43 }
 0x1f0   : > { %v835_v52 = vpack.c.bf16 %v821_v48, %v820_v46  ;;  %v834_v53 = vpack.c.bf16 %v819_v49, %v818_v47  ;;  %v1405_v47 = vld [vmem:[%s2217_s16] ss:$0 sm:$0xff] }
 0x1f1   : > { %v766_v54 = vpop.permute.xlu1 %765  ;;  %v761_v55 = vpop.permute.xlu0 %760 }
 0x1f2   : > { %v823_v56 = vmul.f32 %v766_v54, %v711_v50  ;;  %v822_v57 = vmul.f32 %v761_v55, %v710_v51  ;;  %1505 = vmatprep.mubr.msk.bf16.mxu0 %vm918_vm2, %v834_v53 }
 0x1f3   : > { %1506 = vmatmul.mubr.msk.bf16.vlgmr.msra.gmra.mrb[0].mxu0 %vm918_vm2, %v835_v52 }
 0x1f4   : > { %v836_v60 = vpack.c.bf16 %v823_v56, %v822_v57 }
 0x1f5   : > { %v776_v61 = vpop.permute.xlu1 %775  ;;  %v771_v62 = vpop.permute.xlu0 %770 }
 0x1f6   : > { %v825_v63 = vmul.f32 %v776_v61, %v713_v58  ;;  %v824_v0 = vmul.f32 %v771_v62, %v712_v59  ;;  %1509 = vmatprep.mubr.msk.bf16.mxu0 %vm918_vm2, %v836_v60 }
 0x1f8   : > { %v837_v3 = vpack.c.bf16 %v825_v63, %v824_v0 }
 0x1f9   : > { %v786_v4 = vpop.permute.xlu1 %785  ;;  %v781_v5 = vpop.permute.xlu0 %780 }
 0x1fa   : > { %v827_v6 = vmul.f32 %v786_v4, %v715_v1  ;;  %v826_v7 = vmul.f32 %v781_v5, %v714_v2 }
 0x1fb   : > { %1510 = vmatmul.mubr.msk.bf16.gmra.mrb[4].mxu0 %vm918_vm2, %v837_v3 }
 0x1fc   : > { %v838_v10 = vpack.c.bf16 %v827_v6, %v826_v7 }
 0x1fd   : > { %v796_v11 = vpop.permute.xlu1 %795  ;;  %v791_v12 = vpop.permute.xlu0 %790 }
 0x1fe   : > { %v829_v13 = vmul.f32 %v796_v11, %v717_v8  ;;  %v828_v14 = vmul.f32 %v791_v12, %v716_v9  ;;  %1513 = vmatprep.mubr.msk.bf16.mxu0 %vm918_vm2, %v838_v10 }
 0x200   : > { %v839_v17 = vpack.c.bf16 %v829_v13, %v828_v14 }
 0x201   : > { %v806_v18 = vpop.permute.xlu1 %805  ;;  %v801_v19 = vpop.permute.xlu0 %800 }
 0x202   : > { %v831_v20 = vmul.f32 %v806_v18, %v719_v15  ;;  %v830_v21 = vmul.f32 %v801_v19, %v718_v16 }
 0x203   : > { %1514 = vmatmul.mubr.msk.bf16.gmra.mrb[8].mxu0 %vm918_vm2, %v839_v17 }
 0x204   : > { %v840_v24 = vpack.c.bf16 %v831_v20, %v830_v21 }
 0x205   : > { %v816_v25 = vpop.permute.xlu1 %815  ;;  %v811_v26 = vpop.permute.xlu0 %810 }
 0x206   : > { %v833_v27 = vmul.f32 %v816_v25, %v721_v22  ;;  %v832_v28 = vmul.f32 %v811_v26, %v720_v23  ;;  %1517 = vmatprep.mubr.msk.bf16.mxu0 %vm918_vm2, %v840_v24 }
 0x208   : > { %v841_v29 = vpack.c.bf16 %v833_v27, %v832_v28 }
 0x20b   : > { %1518 = vmatmul.mubr.msk.bf16.gmra.mrb[12].mxu0 %vm918_vm2, %v841_v29 }
 0x246   : > { %v1487_v30 = vpop.f32.mrb[0].mxu1 }
 0x247   : > { %v977_v31 = vpop.f32.mrb[1].mxu1 }
 0x248   : > { %v1488_v32 = vpop.f32.mrb[2].mxu1 }
 0x249   : > { %v980_v33 = vpop.f32.mrb[3].mxu1 }
 0x24e   : > { %v1491_v34 = vpop.f32.mrb[4].mxu1 }
 0x24f   : > { %v993_v35 = vpop.f32.mrb[5].mxu1 }
 0x250   : > { %v1492_v36 = vpop.f32.mrb[6].mxu1 }
 0x251   : > { %v996_v37 = vpop.f32.mrb[7].mxu1 }
 0x256   : > { %v1495_v38 = vpop.f32.mrb[8].mxu1 }
 0x257   : > { %v1009_v39 = vpop.f32.mrb[9].mxu1 }
 0x258   : > { %v1496_v40 = vpop.f32.mrb[10].mxu1 }
 0x259   : > { %v1012_v41 = vpop.f32.mrb[11].mxu1 }
 0x25e   : > { %v1499_v42 = vpop.f32.mrb[12].mxu1 }
 0x25f   : > { %v1025_v43 = vpop.f32.mrb[13].mxu1 }
 0x260   : > { %v1500_v44 = vpop.f32.mrb[14].mxu1 }
 0x261   : > { %v1028_v45 = vpop.f32.mrb[15].mxu1 }
 0x2c6   : > { %v1507_v46 = vpop.f32.mrb[0].mxu0 }
 0x2c7   : > { %v1119_v48 = vadd.f32 %v1507_v46, %v1487_v30  ;;  %v1110_v49 = vpop.f32.mrb[1].mxu0 }
 0x2c8   : > { %v1111_v50 = vadd.f32 %v1110_v49, %v977_v31  ;;  %v1508_v51 = vpop.f32.mrb[2].mxu0 }
 0x2c9   : > { %v1182_v52 = vadd.f32 %v1405_v47, %v1119_v48  ;;  %v1122_v53 = vadd.f32 %v1508_v51, %v1488_v32  ;;  %v1113_v54 = vpop.f32.mrb[3].mxu0 }
 0x2ca   : > { %v1180_v55 = vadd.f32 %v1405_v47, %v1111_v50  ;;  %v1114_v56 = vadd.f32 %v1113_v54, %v980_v33 }
 0x2cb   : > { %1198 = vst [vmem:[%s1995_s29 + $0x10] sm:$0xff] %v1182_v52  ;;  %v1183_v57 = vadd.f32 %v1405_v47, %v1122_v53 }
 0x2cc   : > { %1196 = vst [vmem:[%s1995_s29] sm:$0xff] %v1180_v55  ;;  %v1181_v58 = vadd.f32 %v1405_v47, %v1114_v56 }
 0x2cd   : > { %1199 = vst [vmem:[%s1995_s29 + $0x18] sm:$0xff] %v1183_v57 }
 0x2ce   : > { %1197 = vst [vmem:[%s1995_s29 + $0x8] sm:$0xff] %v1181_v58  ;;  %v1511_v59 = vpop.f32.mrb[4].mxu0 }
 0x2cf   : > { %v1135_v60 = vadd.f32 %v1511_v59, %v1491_v34  ;;  %v1126_v61 = vpop.f32.mrb[5].mxu0 }
 0x2d0   : > { %v1127_v62 = vadd.f32 %v1126_v61, %v993_v35  ;;  %v1512_v63 = vpop.f32.mrb[6].mxu0 }
 0x2d1   : > { %v1186_v0 = vadd.f32 %v1405_v47, %v1135_v60  ;;  %v1138_v1 = vadd.f32 %v1512_v63, %v1492_v36  ;;  %v1129_v2 = vpop.f32.mrb[7].mxu0 }
 0x2d2   : > { %v1184_v3 = vadd.f32 %v1405_v47, %v1127_v62  ;;  %v1130_v4 = vadd.f32 %v1129_v2, %v996_v37 }
 0x2d3   : > { %1202 = vst [vmem:[%s1995_s29 + $0x30] sm:$0xff] %v1186_v0  ;;  %v1187_v5 = vadd.f32 %v1405_v47, %v1138_v1 }
 0x2d4   : > { %1200 = vst [vmem:[%s1995_s29 + $0x20] sm:$0xff] %v1184_v3  ;;  %v1185_v6 = vadd.f32 %v1405_v47, %v1130_v4 }
 0x2d5   : > { %1203 = vst [vmem:[%s1995_s29 + $0x38] sm:$0xff] %v1187_v5 }
 0x2d6   : > { %1201 = vst [vmem:[%s1995_s29 + $0x28] sm:$0xff] %v1185_v6  ;;  %v1515_v7 = vpop.f32.mrb[8].mxu0 }
 0x2d7   : > { %v1151_v8 = vadd.f32 %v1515_v7, %v1495_v38  ;;  %v1142_v9 = vpop.f32.mrb[9].mxu0 }
 0x2d8   : > { %v1143_v10 = vadd.f32 %v1142_v9, %v1009_v39  ;;  %v1516_v11 = vpop.f32.mrb[10].mxu0 }
 0x2d9   : > { %v1190_v12 = vadd.f32 %v1405_v47, %v1151_v8  ;;  %v1154_v13 = vadd.f32 %v1516_v11, %v1496_v40  ;;  %v1145_v14 = vpop.f32.mrb[11].mxu0 }
 0x2da   : > { %v1188_v15 = vadd.f32 %v1405_v47, %v1143_v10  ;;  %v1146_v16 = vadd.f32 %v1145_v14, %v1012_v41 }
 0x2db   : > { %1206 = vst [vmem:[%s1995_s29 + $0x50] sm:$0xff] %v1190_v12  ;;  %v1191_v17 = vadd.f32 %v1405_v47, %v1154_v13 }
 0x2dc   : > { %1204 = vst [vmem:[%s1995_s29 + $0x40] sm:$0xff] %v1188_v15  ;;  %v1189_v18 = vadd.f32 %v1405_v47, %v1146_v16 }
 0x2dd   : > { %1207 = vst [vmem:[%s1995_s29 + $0x58] sm:$0xff] %v1191_v17 }
 0x2de   : > { %1205 = vst [vmem:[%s1995_s29 + $0x48] sm:$0xff] %v1189_v18  ;;  %v1519_v19 = vpop.f32.mrb[12].mxu0 }
 0x2df   : > { %v1167_v20 = vadd.f32 %v1519_v19, %v1499_v42  ;;  %v1158_v21 = vpop.f32.mrb[13].mxu0 }
 0x2e0   : > { %v1159_v22 = vadd.f32 %v1158_v21, %v1025_v43  ;;  %v1520_v23 = vpop.f32.mrb[14].mxu0 }
 0x2e1   : > { %v1194_v24 = vadd.f32 %v1405_v47, %v1167_v20  ;;  %v1170_v25 = vadd.f32 %v1520_v23, %v1500_v44  ;;  %v1161_v26 = vpop.f32.mrb[15].mxu0 }
 0x2e2   : > { %v1192_v27 = vadd.f32 %v1405_v47, %v1159_v22  ;;  %v1162_v28 = vadd.f32 %v1161_v26, %v1028_v45 }
 0x2e3   : > { %1210 = vst [vmem:[%s1995_s29 + $0x70] sm:$0xff] %v1194_v24  ;;  %v1195_v29 = vadd.f32 %v1405_v47, %v1170_v25 }
 0x2e4   : > { %1208 = vst [vmem:[%s1995_s29 + $0x60] sm:$0xff] %v1192_v27  ;;  %v1193_v30 = vadd.f32 %v1405_v47, %v1162_v28 }
 0x2e5   : > { %1211 = vst [vmem:[%s1995_s29 + $0x78] sm:$0xff] %v1195_v29 }
 0x2e6   : > { %1209 = vst [vmem:[%s1995_s29 + $0x68] sm:$0xff] %v1193_v30 }
 0x2e7 PF: > { %s1412_s20 = sshll.u32 %s1792_s23, 11  ;;  %s2218_s13 = sld [smem:[#allocation20_spill]] }
 0x2e8   : > { %s1226_s2 = sshll.u32 %s1995_s29, 4  ;;  %s2219_s22 = sand.u32 1, %s1772_s18   ;;  %s2123_s2 = int_to_ptr.vmem [resolvable:$true] %s1226_s2 }
 0x2e9   : > { %s2127_s25 = scalar_lea.sflag [#allocation8], %s2219_s22  ;;  %s1692_s28 = scalar_lea.vmem %s2123_s2, 2048 }
 0x2ea   : > { %p1693_p5 = scmp.ne.s32.totalorder %s2123_s2, %s1692_s28  ;;  %s1810_s23 = smov [#allocation7]  }
 0x2eb   : > { %s1696_s11 = sshll.u32 %s1810_s23, 4  ;;  %s1697_s11 = int_to_ptr.vmem [resolvable:$false] %s1696_s11 }
 0x2ec   : > { %p1694_p6 = pnand %p1693_p5, %p1944_p4  ;;  %s1698_s10 = scalar_lea.vmem %s1697_s11, 4096 }
 0x2ed   : > { %s2120_s27 = scalar_lea.hbm %s2218_s13, %s1412_s20  ;;  %p1699_p9 = scmp.lt.s32.totalorder %s2123_s2, %s1697_s11 }
 0x2ee   : > { %p1695_p8 = pneg %p1694_p6  ;;  %p1700_p10 = scmp.lt.s32.totalorder %s1698_s10, %s1692_s28 }
 0x2f0   : > { %p1701_p11 = por %p1700_p10, %p1699_p9 }
 0x2f2   : > { %p1702_p12 = pnand %p1701_p11, %p1695_p8 }
 0x2f4   : > { %1705 = shalt.err (!%p1702_p12)
}
 0x2f5   : > { %s1706_s29 = scalar_lea.hbm %s2120_s27, 2048  ;;  %s1710_s12 = scalar_lea.hbm %s2218_s13, 4096 }
 0x2f6   : > { %p1707_p13 = scmp.ne.s32.totalorder %s2120_s27, %s1706_s29  ;;  %p1711_p2 = scmp.lt.u32.totalorder %s2120_s27, %s2218_s13 }
 0x2f7   : > { %p1712_p3 = scmp.lt.u32.totalorder %s1710_s12, %s1706_s29  ;;  %p1714_p6 = scmp.lt.u32.totalorder %s1706_s29, %s2120_s27 }
 0x2f8   : > { %p1708_p0 = pnand %p1707_p13, %p1944_p4 }
 0x2f9   : > { %p1713_p5 = por %p1712_p3, %p1711_p2 }
 0x2fa   : > { %p1709_p1 = pneg %p1708_p0 }
 0x2fb   : > { %p1715_p8 = por %p1714_p6, %p1713_p5 }
 0x2fd   : > { %p1716_p9 = pnand %p1715_p8, %p1709_p1 }
 0x2ff   : > { %1719 = shalt.err (!%p1716_p9)
}
 0x300   : > { %s1811_s16 = smov 128   ;;  %s1812_s20 = smov 8  }
 0x301   : > { %1553 = dma.vmem_to_hbm [thread:$0]  (%p1944_p4), %s2123_s2, 2048, %s2120_s27, %s2127_s25, %s1811_s16, %s1811_s16, %s1812_s20  }
 0x302 PF: > { %p1559_p10 = scmp.ge.s32.totalorder %s1804_s26, 2  ;;  %s1241_s24 = sand.u32 1, %s1768_s1  }
 0x303   : > { %s1242_s0 = scalar_lea.sflag [#allocation8], %s1241_s24 }
 0x304   : > { %p1556_p11 = pnand %p1559_p10, %p1953_p7 }
 0x306   : > { %1763 = dma.done.wait (!%p1556_p11), %s1242_s0, 2048  }
 0x307   : > { %1765 = vsyncadd (!%p1556_p11), %s1242_s0, 4294965248  ;;  %s32_s26 = sadd.s32 1, %s1804_s26   ;;  %s2220_s22 = sld [smem:[#allocation15_spill]] }
 0x308   : > { %p29_p12 = scmp.ge.s32.totalorder %s32_s26, 6   ;;  %s2221_s30 = sld [smem:[#allocation16_spill]] }
 0x309   : > { %s2222_s27 = sld [smem:[#allocation11_spill]]  ;;  %s2223_s23 = sld [smem:[#allocation12_spill]] }
 0x30a   : > { %s2224_s24 = sld [smem:[#allocation13_spill]]  ;;  %s2225_s25 = sld [smem:[#allocation14_spill]] }
 0x30b   : > { %s2226_s1 = smov %s1772_s18  ;;  %s2227_s18 = smov %s1776_s19 }
 0x30c   : > { %s2229_s20 = smov %s1784_s21  ;;  %31 = sbr.rel (!%p29_p12) target bundleno = 33 (0x21), region = 147 }
 0x30d   : > { %s2228_s19 = smov %s2220_s22 }
 0x30e   : > { %s2230_s21 = smov %s2221_s30 }
 0x30f   : > { %s2231_s22 = smov %s2222_s27 }
 0x313   :  { %1247 = vsyncpa [#allocation8], 1 }
 0x314   :  { %1249 = vsyncpa [#allocation8 + $0x1], 1 }

</bundles_post_ra>
